<compile_context>
chip_gen: v6e
topology: v6e:2x2x1
jax: 0.10.0
libtpu: 0.0.40
codegen_flags: <defaults>
</compile_context>

<pallas_src>
import jax
import jax.numpy as jnp
from jax.experimental import pallas as pl
from jax.experimental.pallas import tpu as pltpu


def _round_up(x, m):
    return ((x + m - 1) // m) * m


def _make_mlp_kernel(num_layers):
    """Fused kernel: refs = (x, w1, b1, w2, b2, ..., out). No scratch."""

    def kernel(*refs):
        x_ref = refs[0]
        o_ref = refs[-1]
        h = x_ref[...]
        for layer in range(num_layers):
            w_ref = refs[1 + 2 * layer]
            b_ref = refs[2 + 2 * layer]
            # MXU matmul in the weights' dtype (bf16 by default), f32 accumulate.
            h = jnp.dot(
                h.astype(w_ref.dtype), w_ref[...],
                preferred_element_type=jnp.float32,
            )
            # f32 epilogue: bias + ReLU (dropout == identity at inference).
            h = jnp.maximum(h + b_ref[...].astype(jnp.float32), 0.0)
        o_ref[...] = h.astype(o_ref.dtype)

    return kernel


def mlp_forward(x, params, *, tm=256):
    """y = relu(... relu(x @ W1 + b1) ... @ Wn + bn)  fused in one pallas_call.

    x:      [M, K] activations (f32).
    params: list of (w, b) with w: [in, out], b: [out] (any float dtype).
    """
    M, K = x.shape
    num_layers = len(params)
    assert num_layers >= 1
    n_out = params[-1][0].shape[1]

    # Batch tile: multiple of 8 sublanes; a single tile when the batch is small.
    tm = min(tm, _round_up(M, 8))
    m_pad = _round_up(M, tm)
    if m_pad != M:
        x = jnp.pad(x, ((0, m_pad - M), (0, 0)))
    grid = (m_pad // tm,)

    # Input specs: batch-tiled activation + full-array resident weights/biases.
    in_specs = [pl.BlockSpec((tm, K), lambda i: (i, 0))]
    flat_params = []
    for w, b in params:
        k_in, n = w.shape
        assert b.shape == (n,)
        in_specs.append(pl.BlockSpec((k_in, n), lambda i: (0, 0)))  # whole weight
        in_specs.append(pl.BlockSpec((1, n), lambda i: (0, 0)))     # whole bias
        flat_params.append(w)
        flat_params.append(b.reshape(1, n))

    out = pl.pallas_call(
        _make_mlp_kernel(num_layers),
        out_shape=jax.ShapeDtypeStruct((m_pad, n_out), x.dtype),
        grid_spec=pltpu.PrefetchScalarGridSpec(
            num_scalar_prefetch=0,
            grid=grid,
            in_specs=in_specs,
            out_specs=pl.BlockSpec((tm, n_out), lambda i: (i, 0)),
        ),
        compiler_params=pltpu.CompilerParams(
            dimension_semantics=("parallel",),
        ),
    )(x, *flat_params)

    return out[:M] if m_pad != M else out


class MLP:
    """JAX/Pallas port of the PyTorch MLP (inference mode)."""

    def __init__(self, input_dim, mlp_dims, dropout, use_bn=False, *, key=None,
                 param_dtype=jnp.bfloat16):
        # TODO(synk): use_bn=True (BatchNorm1d) path not implemented; default is False.
        assert not use_bn, "use_bn=True path not implemented (default is False)"
        del dropout  # identity at inference
        if key is None:
            key = jax.random.PRNGKey(0)
        self.params = []
        in_dim = input_dim
        for out_dim in mlp_dims:
            key, wk, bk = jax.random.split(key, 3)
            # Deterministic init mimicking nn.Linear's U(-1/sqrt(in), 1/sqrt(in)).
            bound = 1.0 / (in_dim ** 0.5)
            w = jax.random.uniform(
                wk, (in_dim, out_dim), jnp.float32, minval=-bound, maxval=bound
            ).astype(param_dtype)
            b = jax.random.uniform(
                bk, (out_dim,), jnp.float32, minval=-bound, maxval=bound
            ).astype(param_dtype)
            self.params.append((w, b))
            in_dim = out_dim

    def __call__(self, x):
        return mlp_forward(x, self.params)


def _reference(x, params):
    """Plain-JAX reference using the same bf16-weight / f32-accumulate math."""
    h = x
    for w, b in params:
        h = jnp.dot(h.astype(w.dtype), w, preferred_element_type=jnp.float32)
        h = jnp.maximum(h + b.astype(jnp.float32), 0.0)
    return h.astype(x.dtype)


if __name__ == "__main__":
    # Shapes consistent with the module's forward:
    #   x: [batch, input_dim] = [8, 128], mlp_dims = (256, 128)
    batch, input_dim = 8, 128
    mlp_dims = (256, 128)

    key = jax.random.PRNGKey(0)
    xkey, pkey = jax.random.split(key)
    x = jax.random.normal(xkey, (batch, input_dim), dtype=jnp.float32)

    model = MLP(input_dim, mlp_dims, dropout=0.1, use_bn=False, key=pkey)

    out = jax.block_until_ready(model(x))
    ref = _reference(x, model.params)
    assert out.shape == (batch, mlp_dims[-1])
    assert jnp.allclose(out, ref, atol=1e-3, rtol=1e-3)

    # Also exercise the non-divisible-batch (padded) path.
    x_odd = jax.random.normal(xkey, (5, input_dim), dtype=jnp.float32)
    out_odd = jax.block_until_ready(model(x_odd))
    ref_odd = _reference(x_odd, model.params)
    assert out_odd.shape == (5, mlp_dims[-1])
    assert jnp.allclose(out_odd, ref_odd, atol=1e-3, rtol=1e-3)

    print("KERNEL_OK")
</pallas_src>

<mosaic_0001>
module attributes {stable_mosaic.version = 11 : i64} {
  func.func @kernel(%arg0: i32, %arg1: memref<8x128xf32, #tpu.memory_space<vmem>>, %arg2: memref<128x256xbf16, #tpu.memory_space<vmem>>, %arg3: memref<1x256xbf16, #tpu.memory_space<vmem>>, %arg4: memref<256x128xbf16, #tpu.memory_space<vmem>>, %arg5: memref<1x128xbf16, #tpu.memory_space<vmem>>, %arg6: memref<8x128xf32, #tpu.memory_space<vmem>>) attributes {dimension_semantics = [#tpu.dimension_semantics<parallel>], iteration_bounds = array<i64: 1>, scalar_prefetch = 0 : i64, scratch_operands = 0 : i64, tpu.core_type = #tpu.core_type<tc>, window_params = [{transform_indices = @transform_0, window_bounds = array<i64: 8, 128>}, {pipeline_mode = #tpu.pipeline_mode<synchronous>, transform_indices = @transform_1, window_bounds = array<i64: 128, 256>}, {pipeline_mode = #tpu.pipeline_mode<synchronous>, transform_indices = @transform_2, window_bounds = array<i64: 1, 256>}, {pipeline_mode = #tpu.pipeline_mode<synchronous>, transform_indices = @transform_3, window_bounds = array<i64: 256, 128>}, {pipeline_mode = #tpu.pipeline_mode<synchronous>, transform_indices = @transform_4, window_bounds = array<i64: 1, 128>}, {transform_indices = @transform_5, window_bounds = array<i64: 8, 128>}]} {
    %c0 = arith.constant 0 : index
    %c0_0 = arith.constant 0 : index
    %0 = vector.load %arg1[%c0, %c0_0] : memref<8x128xf32, #tpu.memory_space<vmem>>, vector<8x128xf32>
    %1 = arith.truncf %0 : vector<8x128xf32> to vector<8x128xbf16>
    %c0_1 = arith.constant 0 : index
    %c0_2 = arith.constant 0 : index
    %2 = vector.load %arg2[%c0_1, %c0_2] : memref<128x256xbf16, #tpu.memory_space<vmem>>, vector<128x256xbf16>
    %cst = arith.constant dense<0.000000e+00> : vector<8x256xf32>
    %3 = tpu.matmul %1, %2, %cst {dimension_numbers = #tpu.dot_dimension_numbers<[1], [0], [0], [1], [0, 0, 1, 1], [], []>} : vector<8x128xbf16>, vector<128x256xbf16>, vector<8x256xf32> -> vector<8x256xf32>
    %c0_3 = arith.constant 0 : index
    %c0_4 = arith.constant 0 : index
    %4 = vector.load %arg3[%c0_3, %c0_4] : memref<1x256xbf16, #tpu.memory_space<vmem>>, vector<1x256xbf16>
    %5 = arith.extf %4 : vector<1x256xbf16> to vector<1x256xf32>
    %6 = vector.broadcast %5 : vector<1x256xf32> to vector<8x256xf32>
    %7 = arith.addf %3, %6 : vector<8x256xf32>
    %cst_5 = arith.constant 0.000000e+00 : f32
    %8 = vector.broadcast %cst_5 : f32 to vector<8x256xf32>
    %9 = arith.maximumf %7, %8 : vector<8x256xf32>
    %10 = arith.truncf %9 : vector<8x256xf32> to vector<8x256xbf16>
    %c0_6 = arith.constant 0 : index
    %c0_7 = arith.constant 0 : index
    %11 = vector.load %arg4[%c0_6, %c0_7] : memref<256x128xbf16, #tpu.memory_space<vmem>>, vector<256x128xbf16>
    %cst_8 = arith.constant dense<0.000000e+00> : vector<8x128xf32>
    %12 = tpu.matmul %10, %11, %cst_8 {dimension_numbers = #tpu.dot_dimension_numbers<[1], [0], [0], [1], [0, 0, 1, 1], [], []>} : vector<8x256xbf16>, vector<256x128xbf16>, vector<8x128xf32> -> vector<8x128xf32>
    %c0_9 = arith.constant 0 : index
    %c0_10 = arith.constant 0 : index
    %13 = vector.load %arg5[%c0_9, %c0_10] : memref<1x128xbf16, #tpu.memory_space<vmem>>, vector<1x128xbf16>
    %14 = arith.extf %13 : vector<1x128xbf16> to vector<1x128xf32>
    %15 = vector.broadcast %14 : vector<1x128xf32> to vector<8x128xf32>
    %16 = arith.addf %12, %15 : vector<8x128xf32>
    %cst_11 = arith.constant 0.000000e+00 : f32
    %17 = vector.broadcast %cst_11 : f32 to vector<8x128xf32>
    %18 = arith.maximumf %16, %17 : vector<8x128xf32>
    %c0_12 = arith.constant 0 : index
    %c0_13 = arith.constant 0 : index
    %19 = vector.load %arg6[%c0_12, %c0_13] : memref<8x128xf32, #tpu.memory_space<vmem>>, vector<8x128xf32>
    tpu.vector_store %arg6[%c0_12, %c0_13], %18 {strides = array<i32>} : memref<8x128xf32, #tpu.memory_space<vmem>>, vector<8x128xf32>,
    return
  }
  func.func @transform_0(%arg0: i32) -> (i32, i32) {
    %c0_i32 = arith.constant 0 : i32
    %c0_i32_0 = arith.constant 0 : i32
    return %arg0, %c0_i32 : i32, i32
  }
  func.func @transform_1(%arg0: i32) -> (i32, i32) {
    %c0_i32 = arith.constant 0 : i32
    %c0_i32_0 = arith.constant 0 : i32
    %c0_i32_1 = arith.constant 0 : i32
    return %c0_i32, %c0_i32_0 : i32, i32
  }
  func.func @transform_2(%arg0: i32) -> (i32, i32) {
    %c0_i32 = arith.constant 0 : i32
    %c0_i32_0 = arith.constant 0 : i32
    %c0_i32_1 = arith.constant 0 : i32
    return %c0_i32, %c0_i32_0 : i32, i32
  }
  func.func @transform_3(%arg0: i32) -> (i32, i32) {
    %c0_i32 = arith.constant 0 : i32
    %c0_i32_0 = arith.constant 0 : i32
    %c0_i32_1 = arith.constant 0 : i32
    return %c0_i32, %c0_i32_0 : i32, i32
  }
  func.func @transform_4(%arg0: i32) -> (i32, i32) {
    %c0_i32 = arith.constant 0 : i32
    %c0_i32_0 = arith.constant 0 : i32
    %c0_i32_1 = arith.constant 0 : i32
    return %c0_i32, %c0_i32_0 : i32, i32
  }
  func.func @transform_5(%arg0: i32) -> (i32, i32) {
    %c0_i32 = arith.constant 0 : i32
    %c0_i32_0 = arith.constant 0 : i32
    return %arg0, %c0_i32 : i32, i32
  }
}

</mosaic_0001>

<bundles_post_ra>
// kernel: tpu_custom_call.1
= control target key start
LH: loop header
LB: loop body
LE: loop exit
PB: predicated region body
PF: predicated region fallthrough
CT: control target
= control target key end

     0   :  { %10 = vsyncpa [#allocation3], 0  ;;  %s663_s0 = inlined_call_operand.hbm [shape: f32[8,128], index: 0, kind: input, shape index: {}]   ;;  %s664_s1 = inlined_call_operand.hbm [shape: bf16[128,256], index: 1, kind: input, shape index: {}]   ;;  %s665_s2 = inlined_call_operand.vmem [shape: bf16[1,256], index: 2, kind: input, shape index: {}]   ;;  %s666_s3 = inlined_call_operand.hbm [shape: bf16[256,128], index: 3, kind: input, shape index: {}]   ;;  %s667_s4 = inlined_call_operand.vmem [shape: bf16[1,128], index: 4, kind: input, shape index: {}]   ;;  %s668_s5 = inlined_call_operand.hbm [shape: f32[8,128], index: 5, kind: output, shape index: {}]  }
   0x1   :  { %11 = vsyncpa [#allocation6], 0 }
   0x2   :  { %12 = vsyncpa [#allocation4], 0  ;;  %s606_s18 = smov [#allocation5]  }
   0x3   :  { %s28_s19 = sshll.u32 %s606_s18, 4  ;;  %s29_s19 = int_to_ptr.vmem [resolvable:$true] %s28_s19 }
   0x4   :  { %s528_s20 = scalar_lea.vmem %s29_s19, 2048  ;;  %p533_p1 = scmp.lt.s32.totalorder %s29_s19, %s29_s19 }
   0x5   :  { %p529_p0 = scmp.ne.s32.totalorder %s29_s19, %s528_s20  ;;  %p534_p2 = scmp.lt.s32.totalorder %s528_s20, %s528_s20 }
   0x7   :  { %p535_p3 = por %p534_p2, %p533_p1 }
   0x9   :  { %p536_p4 = pnand %p535_p3, %p529_p0 }
   0xb   :  { %539 = shalt.err (!%p536_p4)
}
   0xc   :  { %s607_s21 = smov 128   ;;  %s608_s22 = smov 8  }
   0xd   :  { %34 = dma.hbm_to_vmem [thread:$0]  %s664_s1, 2048, %s29_s19, [#allocation6], %s607_s21, %s607_s21, %s608_s22  }
   0xe   :  { %s609_s25 = smov [#allocation2]   ;;  %s610_s27 = smov [#allocation7]  }
   0xf   :  { %s19_s26 = sshll.u32 %s609_s25, 4  ;;  %s42_s28 = sshll.u32 %s610_s27, 4  ;;  %s20_s26 = int_to_ptr.vmem [resolvable:$true] %s19_s26  ;;  %s43_s28 = int_to_ptr.vmem [resolvable:$true] %s42_s28 }
  0x10   :  { %s548_s29 = scalar_lea.vmem %s20_s26, 128  ;;  %p553_p6 = scmp.lt.s32.totalorder %s20_s26, %s20_s26 }
  0x11   :  { %p549_p5 = scmp.ne.s32.totalorder %s20_s26, %s548_s29  ;;  %p554_p7 = scmp.lt.s32.totalorder %s548_s29, %s548_s29 }
  0x13   :  { %p555_p8 = por %p554_p7, %p553_p6 }
  0x15   :  { %p556_p9 = pnand %p555_p8, %p549_p5 }
  0x17   :  { %559 = shalt.err (!%p556_p9)
}
  0x18   :  { %22 = dma.hbm_to_vmem [thread:$0]  %s663_s0, 128, %s20_s26, [#allocation3]  }
  0x19   :  { %s568_s7 = scalar_lea.vmem %s43_s28, 2048  ;;  %p573_p11 = scmp.lt.s32.totalorder %s43_s28, %s43_s28 }
  0x1a   :  { %p569_p10 = scmp.ne.s32.totalorder %s43_s28, %s568_s7  ;;  %p574_p12 = scmp.lt.s32.totalorder %s568_s7, %s568_s7 }
  0x1c   :  { %p575_p13 = por %p574_p12, %p573_p11 }
  0x1e   :  { %p576_p0 = pnand %p575_p13, %p569_p10 }
  0x20   :  { %579 = shalt.err (!%p576_p0)
}
  0x21   :  { %s611_s1 = smov 64   ;;  %s612_s8 = smov 4  }
  0x22   :  { %48 = dma.hbm_to_vmem [thread:$0]  %s666_s3, 2048, %s43_s28, [#allocation6], %s611_s1, %s611_s1, %s612_s8  }
  0x23   :  { %600 = dma.done.wait [#allocation3], 128  }
  0x24   :  { %601 = vsyncadd [#allocation3], 4294967168 }
  0x25   :  { %602 = dma.done.wait [#allocation6], 4096  }
  0x26   :  { %603 = vsyncadd [#allocation6], 4294963200  ;;  %v613_v0 = vmov 0   ;;  %v480_v1 = vld [vmem:[#allocation5 + $0x74] ss:$8 sps:$4 sm:$0xff]   ;;  %v508_v15 = vld [vmem:[#allocation7 + $0x68] sm:$0xff]   ;;  %v82_v35 = vlaneseq }
  0x27   :  { %212 = vmatprep.mubr.bf16.mxu0 %v613_v0  ;;  %v482_v2 = vld [vmem:[#allocation5 + $0x70] ss:$8 sps:$4 sm:$0xff]   ;;  %180 = vmatprep.subr.bf16.mxu0 %v480_v1  ;;  %v483_v3 = vld [vmem:[#allocation5 + $0x64] ss:$8 sps:$4 sm:$0xff]   ;;  %v485_v4 = vld [vmem:[#allocation5 + $0x60] ss:$8 sps:$4 sm:$0xff]  }
  0x28   :  { %181 = vmatpush1.bf16.msra.mxu0 %v482_v2  ;;  %v486_v5 = vld [vmem:[#allocation5 + $0x54] ss:$8 sps:$4 sm:$0xff]   ;;  %v488_v6 = vld [vmem:[#allocation5 + $0x50] ss:$8 sps:$4 sm:$0xff]   ;;  %v489_v7 = vld [vmem:[#allocation5 + $0x44] ss:$8 sps:$4 sm:$0xff]  }
  0x29   :  { %182 = vmatprep.subr.bf16.mxu0 %v483_v3  ;;  %v491_v8 = vld [vmem:[#allocation5 + $0x40] ss:$8 sps:$4 sm:$0xff]   ;;  %v492_v9 = vld [vmem:[#allocation5 + $0x34] ss:$8 sps:$4 sm:$0xff]   ;;  %v494_v12 = vld [vmem:[#allocation5 + $0x30] ss:$8 sps:$4 sm:$0xff]  }
  0x2a   :  { %v504_v10 = vld [vmem:[#allocation7 + $0x78] sm:$0xff]   ;;  %v506_v13 = vld [vmem:[#allocation7 + $0x70] sm:$0xff]   ;;  %v495_v16 = vld [vmem:[#allocation5 + $0x24] ss:$8 sps:$4 sm:$0xff]   ;;  %v83_v36 = vshrl.u32 %v82_v35, 7  ;;  %s614_s12 = smov [#allocation8]  }
  0x2b   :  { %v505_v11 = vld [vmem:[#allocation7 + $0x38] sm:$0xff]   ;;  %449 = vmatprep.subr.bf16.mxu1 %v504_v10  ;;  %v507_v14 = vld [vmem:[#allocation7 + $0x30] sm:$0xff]   ;;  %v497_v17 = vld [vmem:[#allocation5 + $0x20] ss:$8 sps:$4 sm:$0xff]   ;;  %s407_s13 = sshll.u32 %s614_s12, 4  ;;  %s408_s13 = int_to_ptr.vmem [resolvable:$true] %s407_s13 }
  0x2c   :  { %183 = vmatpush1.bf16.msra.mxu0 %v485_v4  ;;  %450 = vmatpush3.bf16.msra.mxu1 %v505_v11  ;;  %v509_v18 = vld [vmem:[#allocation7 + $0x28] sm:$0xff]   ;;  %v510_v19 = vld [vmem:[#allocation7 + $0x60] sm:$0xff]   ;;  %v498_v20 = vld [vmem:[#allocation5 + $0x14] ss:$8 sps:$4 sm:$0xff]   ;;  %v84_v39 = vsub.s32 0, %v83_v36  ;;  %v88_v40 = vsub.s32 2, %v83_v36  ;;  %p585_p2 = scmp.lt.s32.totalorder %s408_s13, %s408_s13 }
  0x2d   :  { %184 = vmatprep.subr.bf16.mxu0 %v486_v5  ;;  %451 = vmatprep.subr.bf16.mxu1 %v506_v13  ;;  %v500_v21 = vld [vmem:[#allocation5 + $0x10] ss:$8 sps:$4 sm:$0xff]   ;;  %v501_v22 = vld [vmem:[#allocation5 + $0x4] ss:$8 sps:$4 sm:$0xff]   ;;  %v503_v26 = vld [vmem:[#allocation5] ss:$8 sps:$4 sm:$0xff]  }
  0x2e   :  { %v511_v23 = vld [vmem:[#allocation7 + $0x20] sm:$0xff]   ;;  %v512_v24 = vld [vmem:[#allocation7 + $0x58] sm:$0xff]   ;;  %v514_v28 = vld [vmem:[#allocation7 + $0x50] sm:$0xff]   ;;  %s580_s14 = scalar_lea.vmem %s408_s13, 128 }
  0x2f   :  { %v513_v25 = vld [vmem:[#allocation7 + $0x18] sm:$0xff]   ;;  %v515_v30 = vld [vmem:[#allocation7 + $0x10] sm:$0xff]   ;;  %v516_v31 = vld [vmem:[#allocation7 + $0x48] sm:$0xff]   ;;  %p581_p1 = scmp.ne.s32.totalorder %s408_s13, %s580_s14  ;;  %p586_p3 = scmp.lt.s32.totalorder %s580_s14, %s580_s14 }
  0x30   :  { %185 = vmatpush1.bf16.msra.mxu0 %v488_v6  ;;  %452 = vmatpush3.bf16.msra.mxu1 %v507_v14  ;;  %v61_v27 = vld [vmem:[#allocation2] sm:$0xff]  ;;  %v517_v32 = vld [vmem:[#allocation7 + $0x8] sm:$0xff]   ;;  %v518_v33 = vld [vmem:[#allocation7 + $0x40] sm:$0xff]  }
  0x31   :  { %186 = vmatprep.subr.bf16.mxu0 %v489_v7  ;;  %453 = vmatprep.subr.bf16.mxu1 %v508_v15  ;;  %v62_v29 = vpack.c.bf16 %v61_v27, %v61_v27  ;;  %v519_v34 = vld [vmem:[#allocation7] sm:$0xff]   ;;  %v79_v37 = vld [vmem:[%s665_s2] sm:$0x3]  ;;  %p587_p4 = por %p586_p3, %p585_p2 }
  0x32   :  { %v80_v38 = vunpack.c.l.bf16 %v79_v37  ;;  %v257_v55 = vld [vmem:[%s667_s4] sm:$0x1] }
  0x33   :  { %v258_v56 = vunpack.c.l.bf16 %v257_v55  ;;  %p588_p5 = pnand %p587_p4, %p581_p1 }
  0x34   :  { %187 = vmatpush1.bf16.msra.mxu0 %v491_v8  ;;  %454 = vmatpush3.bf16.msra.mxu1 %v509_v18  ;;  %v85_v41 = vrot.slane %v80_v38, %v84_v39  ;;  %v89_v42 = vrot.slane %v80_v38, %v88_v40 }
  0x35   :  { %188 = vmatprep.subr.bf16.mxu0 %v492_v9  ;;  %455 = vmatprep.subr.bf16.mxu1 %v510_v19  ;;  %v262_v58 = vrot.slane %v258_v56, %v84_v39 }
  0x36   :  { %v95_v43 = vrot.slane %v85_v41, %v84_v39  ;;  %v99_v44 = vrot.slane %v89_v42, %v84_v39 }
  0x38   :  { %189 = vmatpush1.bf16.msra.mxu0 %v494_v12  ;;  %456 = vmatpush3.bf16.msra.mxu1 %v511_v23 }
  0x39   :  { %190 = vmatprep.subr.bf16.mxu0 %v495_v16  ;;  %457 = vmatprep.subr.bf16.mxu1 %v512_v24 }
  0x3c   :  { %191 = vmatpush1.bf16.msra.mxu0 %v497_v17  ;;  %458 = vmatpush3.bf16.msra.mxu1 %v513_v25 }
  0x3d   :  { %192 = vmatprep.subr.bf16.mxu0 %v498_v20  ;;  %459 = vmatprep.subr.bf16.mxu1 %v514_v28 }
  0x40   :  { %193 = vmatpush1.bf16.msra.mxu0 %v500_v21  ;;  %460 = vmatpush3.bf16.msra.mxu1 %v515_v30 }
  0x41   :  { %194 = vmatprep.subr.bf16.mxu0 %v501_v22  ;;  %461 = vmatprep.subr.bf16.mxu1 %v516_v31 }
  0x44   :  { %195 = vmatpush1.bf16.msra.mxu0 %v503_v26  ;;  %462 = vmatpush3.bf16.msra.mxu1 %v517_v32 }
  0x45   :  { %463 = vmatprep.subr.bf16.mxu1 %v518_v33 }
  0x47   :  { %213 = vmatmul.mubr.bf16.vlgmr.msra.gmra.mxu0 %v62_v29 }
  0x48   :  { %464 = vmatpush3.bf16.msra.mxu1 %v519_v34 }
 0x107   :  { %v214_v45 = vpop.f32.mrf.mxu0 }
 0x108   :  { %v215_v46 = vadd.f32 %v214_v45, %v95_v43 }
 0x109   :  { %v216_v47 = vpop.f32.mrf.mxu0 }
 0x10a   :  { %v217_v48 = vadd.f32 %v216_v47, %v99_v44  ;;  %v221_v49 = vmax.f32 %v215_v46, 0.0 }
 0x10b   :  { %v218_v50 = vpop.f32.mrf.mxu0 }
 0x10c   :  { %v222_v51 = vmax.f32 %v217_v48, 0.0  ;;  %v223_v54 = vpack.c.bf16 %v221_v49, %v221_v49 }
 0x10d   :  { %v219_v52 = vpop.f32.mrf.mxu0 }
 0x10e   :  { %v224_v53 = vpack.c.bf16 %v222_v51, %v222_v51 }
 0x110   :  { %391 = vmatprep.mubr.bf16.mxu1 %v224_v53 }
 0x111   :  { %392 = vmatmul.mubr.bf16.vlgmr.msra.gmra.mxu1 %v223_v54 }
 0x1d1   :  { %v465_v57 = vpop.f32.mrf.mxu1 }
 0x1d3   :  { %v466_v59 = vpop.f32.mrf.mxu1 }
 0x1d4   :  { %v467_v60 = vadd.f32 %v466_v59, %v465_v57 }
 0x1d5   :  { %v468_v61 = vpop.f32.mrf.mxu1 }
 0x1d6   :  { %v394_v62 = vadd.f32 %v467_v60, %v262_v58 }
 0x1d7   :  { %v469_v63 = vpop.f32.mrf.mxu1 }
 0x1d8   :  { %v399_v0 = vmax.f32 %v394_v62, 0.0 }
 0x1da   :  { %400 = vst [vmem:[#allocation8] sm:$0xff] %v399_v0 }
 0x1db   :  { %591 = shalt.err (!%p588_p5)
}
 0x1dc   :  { %410 = dma.vmem_to_hbm [thread:$0]  %s408_s13, 128, %s668_s5, [#allocation4]  }
 0x1dd   :  { %604 = dma.done.wait [#allocation4], 128  }
 0x1de   :  { %605 = vsyncadd [#allocation4], 4294967168 }
 0x1df   :  { %414 = vsyncpa [#allocation3], 1 }
 0x1e0   :  { %415 = vsyncpa [#allocation6], 1 }
 0x1e1   :  { %416 = vsyncpa [#allocation4], 1 }

</bundles_post_ra>
